<compile_context>
chip_gen: v6e
topology: v6e:2x2x1
jax: 0.10.0
libtpu: 0.0.40
codegen_flags: <defaults>
</compile_context>

<pallas_src>
import functools

import jax
import jax.numpy as jnp
import numpy as np
from jax.experimental import pallas as pl
from jax.experimental.pallas import tpu as pltpu


# ------------------------------- fused kernel ------------------------------- #

def _tcn_fused_kernel(x_ref, slab_ref, o_ref, *, layout, block_meta,
                      kernel_size, B, L):
    """Entire TCN forward in one kernel invocation.

    x_ref   : (B, L, C0) input window (already sliced to the receptive field).
    slab_ref: (R, W) packed parameter slab; layout[i] = (row_off, rows, cols)
              of the i-th parameter (row offsets are 8-sublane aligned).
    o_ref   : (B, P) output.

    Activation layout: (B*L, C) float32, row = b*L + t (time/batch on the
    sublane axis, channels on lanes).  All intermediates stay in VMEM/vregs.
    """
    K = kernel_size
    BL = B * L

    x = x_ref[...]
    h = x.reshape(BL, x.shape[-1])                 # free leading-dim collapse

    # Hoisted per-row "time index within batch element" (one iota + free
    # reshape) and ONE boolean mask per unique nonzero causal shift (shared by
    # both convs of a block and by any blocks with the same dilation).
    t_in_batch = jax.lax.broadcasted_iota(jnp.int32, (B, L, 1), 1).reshape(BL, 1)
    shifts = sorted({(K - 1 - j) * d for d, _ in block_meta for j in range(K)} - {0})
    causal_mask = {s: t_in_batch >= s for s in shifts if s < L}

    # Sequential reader over the packed parameter slab.  Static slices at
    # 8-aligned row offsets -> zero runtime cost.
    cursor = [0]

    def nxt():
        off, rows, cols = layout[cursor[0]]
        cursor[0] += 1
        return slab_ref[off:off + rows, :cols]

    def causal_conv(inp, dilation):
        # K accumulating MXU matmuls against per-tap (C_in, C_out) weights
        # (no lane-axis im2col concat).  Tap j has causal shift (K-1-j)*dil;
        # shifted taps use an XLU roll along the row axis, and the hoisted
        # mask zeroes both the causal pad and any rows that wrapped / leaked
        # across a batch boundary in the flattened (B*L, C) layout.
        acc = None
        for j in range(K):
            w_tap = nxt()                                    # (C_in, C_out)
            shift = (K - 1 - j) * dilation
            if shift == 0:
                xj = inp
            elif shift >= L:
                continue                                     # tap fully in pad
            else:
                xj = jnp.where(causal_mask[shift],
                               pltpu.roll(inp, shift, axis=0), 0.0)
            term = jnp.dot(xj, w_tap, preferred_element_type=jnp.float32)
            acc = term if acc is None else acc + term
        return acc + nxt()                                   # bias (1, C_out)

    for dilation, has_downsample in block_meta:
        out = jnp.maximum(causal_conv(h, dilation), 0.0)     # conv1+chomp+relu
        # dropout(p=0) is the identity
        out = jnp.maximum(causal_conv(out, dilation), 0.0)   # conv2+chomp+relu
        if has_downsample:
            wd, bd = nxt(), nxt()
            res = jnp.dot(h, wd, preferred_element_type=jnp.float32) + bd
        else:
            res = h
        h = jnp.maximum(out + res, 0.0)

    # Last time step of each batch element -> (B, C_last): one strided read.
    last = h.reshape(B, L, h.shape[-1])[:, L - 1, :]

    # 3-layer regression head.
    w, b = nxt(), nxt()
    z = jnp.maximum(jnp.dot(last, w, preferred_element_type=jnp.float32) + b, 0.0)
    w, b = nxt(), nxt()
    z = jnp.maximum(jnp.dot(z, w, preferred_element_type=jnp.float32) + b, 0.0)
    w, b = nxt(), nxt()
    o_ref[...] = (jnp.dot(z, w, preferred_element_type=jnp.float32) + b
                  ).astype(o_ref.dtype)


# ------------------------- host-side parameter packing ---------------------- #

def _pack_param_slab(arrays):
    """Pack 2-D f32 arrays into one slab with 8-aligned row offsets."""
    arrs = [np.asarray(a, np.float32) for a in arrays]
    width = max(a.shape[1] for a in arrs)
    layout, off = [], 0
    for a in arrs:
        layout.append((off, a.shape[0], a.shape[1]))
        off += -(-a.shape[0] // 8) * 8
    slab = np.zeros((off, width), np.float32)
    for a, (o, r, c) in zip(arrs, layout):
        slab[o:o + r, :c] = a
    return jnp.asarray(slab), tuple(layout)


def pack_tcn_params(params, *, kernel_size):
    """One-time host prep: flatten every weight/bias into ONE slab, in the
    exact order the kernel consumes them, with conv weights split per tap so
    each (C_in, C_out) tap sits at an 8-aligned row offset."""
    K = kernel_size
    flat, block_meta = [], []
    for i, blk in enumerate(params["blocks"]):
        out_c = blk["w1"].shape[1]
        in_c = blk["w1"].shape[0] // K
        flat += list(np.asarray(blk["w1"], np.float32).reshape(K, in_c, out_c))
        flat += [blk["b1"]]
        flat += list(np.asarray(blk["w2"], np.float32).reshape(K, out_c, out_c))
        flat += [blk["b2"]]
        if blk["has_downsample"]:
            flat += [blk["wd"], blk["bd"]]
        block_meta.append((2 ** i, blk["has_downsample"]))
    r = params["regression"]
    flat += [r["w1"], r["b1"], r["w2"], r["b2"], r["w3"], r["b3"]]
    slab, layout = _pack_param_slab(flat)
    return slab, layout, tuple(block_meta), r["w3"].shape[1]


# ------------------------------ host wrapper -------------------------------- #

def tcn_forward(x, slab, *, layout, block_meta, kernel_size, predict_sensor):
    """x: (B, seq_len, num_inputs) -> (B, predict_sensor).  One pallas_call."""
    B, L, _ = x.shape
    # Only the last time step feeds the head: slice to the causal receptive
    # field (2 convs per block), rounded up to a sublane-friendly multiple of
    # 8.  Bit-identical output, work scales with B*RF instead of B*L.
    rf = 1 + 2 * (kernel_size - 1) * sum(d for d, _ in block_meta)
    l_eff = min(L, -(-rf // 8) * 8)
    if l_eff < L:
        x = x[:, L - l_eff:, :]
        L = l_eff

    kernel = functools.partial(
        _tcn_fused_kernel, layout=layout, block_meta=block_meta,
        kernel_size=kernel_size, B=B, L=L)

    vmem = pl.BlockSpec(memory_space=pltpu.MemorySpace.VMEM)
    return pl.pallas_call(
        kernel,
        out_shape=jax.ShapeDtypeStruct((B, predict_sensor), jnp.float32),
        in_specs=[vmem, vmem],         # one input DMA + one packed-slab DMA
        out_specs=vmem,
    )(x, slab)


# --------------------------- deterministic params --------------------------- #

def init_params(key, num_inputs, num_channels, kernel_size,
                linear_hidden_1, linear_hidden_2, predict_sensor):
    keys = iter(jax.random.split(key, 64))
    blocks = []
    in_c = num_inputs
    for out_c in num_channels:
        # conv weights stored pre-flattened as (K*C_in, C_out), tap-major;
        # taps ~ N(0, 0.01) like TemporalBlock.init_weights.
        w1 = 0.01 * jax.random.normal(next(keys), (kernel_size * in_c, out_c), jnp.float32)
        b1 = 0.05 * jax.random.normal(next(keys), (1, out_c), jnp.float32)
        w2 = 0.01 * jax.random.normal(next(keys), (kernel_size * out_c, out_c), jnp.float32)
        b2 = 0.05 * jax.random.normal(next(keys), (1, out_c), jnp.float32)
        blk = dict(w1=w1, b1=b1, w2=w2, b2=b2, has_downsample=(in_c != out_c))
        if blk["has_downsample"]:
            blk["wd"] = 0.01 * jax.random.normal(next(keys), (in_c, out_c), jnp.float32)
            blk["bd"] = 0.05 * jax.random.normal(next(keys), (1, out_c), jnp.float32)
        blocks.append(blk)
        in_c = out_c

    def linear(key, fan_in, fan_out):
        k1, k2 = jax.random.split(key)
        lim = 1.0 / np.sqrt(fan_in)
        w = jax.random.uniform(k1, (fan_in, fan_out), jnp.float32, -lim, lim)
        b = jax.random.uniform(k2, (1, fan_out), jnp.float32, -lim, lim)
        return w, b

    rw1, rb1 = linear(next(keys), num_channels[-1], linear_hidden_1)
    rw2, rb2 = linear(next(keys), linear_hidden_1, linear_hidden_2)
    rw3, rb3 = linear(next(keys), linear_hidden_2, predict_sensor)
    regression = dict(w1=rw1, b1=rb1, w2=rw2, b2=rb2, w3=rw3, b3=rb3)
    return dict(blocks=blocks, regression=regression)


# ------------------------------ pure-JAX reference -------------------------- #

def _ref_causal_conv(x, w_cat, b, dilation, kernel_size):
    # x: (B, C_in, L); w_cat: (K*C_in, C_out); b: (1, C_out)
    K = kernel_size
    C_in = x.shape[1]
    L = x.shape[-1]
    w = w_cat.reshape(K, C_in, -1)
    acc = jnp.einsum("bcl,co->bol", x, w[K - 1])
    for j in range(K - 1):
        shift = (K - 1 - j) * dilation
        if shift >= L:
            continue
        xs = jnp.pad(x[:, :, :L - shift], ((0, 0), (0, 0), (shift, 0)))
        acc = acc + jnp.einsum("bcl,co->bol", xs, w[j])
    return acc + b.T[None]


def ref_forward(x, params, *, kernel_size):
    h = jnp.transpose(x, (0, 2, 1))                   # (B, C, L)
    for i, blk in enumerate(params["blocks"]):
        dil = 2 ** i
        out = jnp.maximum(_ref_causal_conv(h, blk["w1"], blk["b1"], dil, kernel_size), 0.0)
        out = jnp.maximum(_ref_causal_conv(out, blk["w2"], blk["b2"], dil, kernel_size), 0.0)
        if blk["has_downsample"]:
            res = jnp.einsum("bcl,co->bol", h, blk["wd"]) + blk["bd"].T[None]
        else:
            res = h
        h = jnp.maximum(out + res, 0.0)
    last = h[:, :, -1]
    r = params["regression"]
    z = jnp.maximum(last @ r["w1"] + r["b1"], 0.0)
    z = jnp.maximum(z @ r["w2"] + r["b2"], 0.0)
    return z @ r["w3"] + r["b3"]


# ----------------------------------- main ----------------------------------- #

if __name__ == "__main__":
    B, SEQ_LEN, NUM_INPUTS = 2, 16, 4
    NUM_CHANNELS = [8, 8]
    KERNEL_SIZE = 2
    H1, H2, PREDICT = 32, 16, 9

    key = jax.random.PRNGKey(0)
    k_x, k_p = jax.random.split(key)
    x = jax.random.normal(k_x, (B, SEQ_LEN, NUM_INPUTS), jnp.float32)
    params = init_params(k_p, NUM_INPUTS, NUM_CHANNELS, KERNEL_SIZE,
                         H1, H2, PREDICT)

    slab, layout, block_meta, predict = pack_tcn_params(
        params, kernel_size=KERNEL_SIZE)

    out = jax.block_until_ready(
        tcn_forward(x, slab, layout=layout, block_meta=block_meta,
                    kernel_size=KERNEL_SIZE, predict_sensor=predict))

    ref = jax.block_until_ready(ref_forward(x, params, kernel_size=KERNEL_SIZE))
    np.testing.assert_allclose(np.asarray(out), np.asarray(ref),
                               rtol=1e-5, atol=1e-5)
    assert out.shape == (B, PREDICT)
    print("KERNEL_OK")
</pallas_src>

<mosaic_0001>
module attributes {stable_mosaic.version = 11 : i64} {
  func.func @_tcn_fused_kernel(%arg0: memref<2x8x4xf32, #tpu.memory_space<vmem>>, %arg1: memref<192x32xf32, #tpu.memory_space<vmem>>, %arg2: memref<2x9xf32, #tpu.memory_space<vmem>>) attributes {dimension_semantics = [], scalar_prefetch = 0 : i64, scratch_operands = 0 : i64, tpu.core_type = #tpu.core_type<tc>} {
    %c0 = arith.constant 0 : index
    %c0_0 = arith.constant 0 : index
    %c0_1 = arith.constant 0 : index
    %0 = vector.load %arg0[%c0, %c0_0, %c0_1] : memref<2x8x4xf32, #tpu.memory_space<vmem>>, vector<2x8x4xf32>
    %1 = vector.shape_cast %0 : vector<2x8x4xf32> to vector<16x4xf32>
    %2 = tpu.iota {dimensions = array<i32: 1>} : vector<2x8x1xi32>
    %3 = vector.shape_cast %2 : vector<2x8x1xi32> to vector<16x1xi32>
    %c1_i32 = arith.constant 1 : i32
    %4 = vector.broadcast %c1_i32 : i32 to vector<16x1xi32>
    %5 = arith.cmpi sge, %3, %4 : vector<16x1xi32>
    %c2_i32 = arith.constant 2 : i32
    %6 = vector.broadcast %c2_i32 : i32 to vector<16x1xi32>
    %7 = arith.cmpi sge, %3, %6 : vector<16x1xi32>
    %c0_2 = arith.constant 0 : index
    %c0_3 = arith.constant 0 : index
    %8 = vector.load %arg1[%c0_2, %c0_3] : memref<192x32xf32, #tpu.memory_space<vmem>>, vector<4x8xf32>
    %c1_i32_4 = arith.constant 1 : i32
    %9 = tpu.dynamic_rotate %1 by %c1_i32_4 dim 0 : vector<16x4xf32>, i32 -> vector<16x4xf32>
    %cst = arith.constant 0.000000e+00 : f32
    %10 = vector.shape_cast %5 : vector<16x1xi1> to vector<16x1xi1>
    %11 = vector.broadcast %10 : vector<16x1xi1> to vector<16x4xi1>
    %12 = vector.broadcast %cst : f32 to vector<16x4xf32>
    %13 = arith.select %11, %9, %12 : vector<16x4xi1>, vector<16x4xf32>
    %cst_5 = arith.constant dense<0.000000e+00> : vector<16x8xf32>
    %14 = tpu.matmul %13, %8, %cst_5 {dimension_numbers = #tpu.dot_dimension_numbers<[1], [0], [0], [1], [0, 0, 1, 1], [], []>} : vector<16x4xf32>, vector<4x8xf32>, vector<16x8xf32> -> vector<16x8xf32>
    %c8 = arith.constant 8 : index
    %c0_6 = arith.constant 0 : index
    %15 = vector.load %arg1[%c8, %c0_6] : memref<192x32xf32, #tpu.memory_space<vmem>>, vector<4x8xf32>
    %cst_7 = arith.constant dense<0.000000e+00> : vector<16x8xf32>
    %16 = tpu.matmul %1, %15, %cst_7 {dimension_numbers = #tpu.dot_dimension_numbers<[1], [0], [0], [1], [0, 0, 1, 1], [], []>} : vector<16x4xf32>, vector<4x8xf32>, vector<16x8xf32> -> vector<16x8xf32>
    %17 = arith.addf %14, %16 : vector<16x8xf32>
    %c16 = arith.constant 16 : index
    %c0_8 = arith.constant 0 : index
    %18 = vector.load %arg1[%c16, %c0_8] : memref<192x32xf32, #tpu.memory_space<vmem>>, vector<1x8xf32>
    %19 = vector.broadcast %18 : vector<1x8xf32> to vector<16x8xf32>
    %20 = arith.addf %17, %19 : vector<16x8xf32>
    %cst_9 = arith.constant 0.000000e+00 : f32
    %21 = vector.broadcast %cst_9 : f32 to vector<16x8xf32>
    %22 = arith.maximumf %20, %21 : vector<16x8xf32>
    %c24 = arith.constant 24 : index
    %c0_10 = arith.constant 0 : index
    %23 = vector.load %arg1[%c24, %c0_10] : memref<192x32xf32, #tpu.memory_space<vmem>>, vector<8x8xf32>
    %c1_i32_11 = arith.constant 1 : i32
    %24 = tpu.dynamic_rotate %22 by %c1_i32_11 dim 0 : vector<16x8xf32>, i32 -> vector<16x8xf32>
    %cst_12 = arith.constant 0.000000e+00 : f32
    %25 = vector.shape_cast %5 : vector<16x1xi1> to vector<16x1xi1>
    %26 = vector.broadcast %25 : vector<16x1xi1> to vector<16x8xi1>
    %27 = vector.broadcast %cst_12 : f32 to vector<16x8xf32>
    %28 = arith.select %26, %24, %27 : vector<16x8xi1>, vector<16x8xf32>
    %cst_13 = arith.constant dense<0.000000e+00> : vector<16x8xf32>
    %29 = tpu.matmul %28, %23, %cst_13 {dimension_numbers = #tpu.dot_dimension_numbers<[1], [0], [0], [1], [0, 0, 1, 1], [], []>} : vector<16x8xf32>, vector<8x8xf32>, vector<16x8xf32> -> vector<16x8xf32>
    %c32 = arith.constant 32 : index
    %c0_14 = arith.constant 0 : index
    %30 = vector.load %arg1[%c32, %c0_14] : memref<192x32xf32, #tpu.memory_space<vmem>>, vector<8x8xf32>
    %cst_15 = arith.constant dense<0.000000e+00> : vector<16x8xf32>
    %31 = tpu.matmul %22, %30, %cst_15 {dimension_numbers = #tpu.dot_dimension_numbers<[1], [0], [0], [1], [0, 0, 1, 1], [], []>} : vector<16x8xf32>, vector<8x8xf32>, vector<16x8xf32> -> vector<16x8xf32>
    %32 = arith.addf %29, %31 : vector<16x8xf32>
    %c40 = arith.constant 40 : index
    %c0_16 = arith.constant 0 : index
    %33 = vector.load %arg1[%c40, %c0_16] : memref<192x32xf32, #tpu.memory_space<vmem>>, vector<1x8xf32>
    %34 = vector.broadcast %33 : vector<1x8xf32> to vector<16x8xf32>
    %35 = arith.addf %32, %34 : vector<16x8xf32>
    %cst_17 = arith.constant 0.000000e+00 : f32
    %36 = vector.broadcast %cst_17 : f32 to vector<16x8xf32>
    %37 = arith.maximumf %35, %36 : vector<16x8xf32>
    %c48 = arith.constant 48 : index
    %c0_18 = arith.constant 0 : index
    %38 = vector.load %arg1[%c48, %c0_18] : memref<192x32xf32, #tpu.memory_space<vmem>>, vector<4x8xf32>
    %c56 = arith.constant 56 : index
    %c0_19 = arith.constant 0 : index
    %39 = vector.load %arg1[%c56, %c0_19] : memref<192x32xf32, #tpu.memory_space<vmem>>, vector<1x8xf32>
    %cst_20 = arith.constant dense<0.000000e+00> : vector<16x8xf32>
    %40 = tpu.matmul %1, %38, %cst_20 {dimension_numbers = #tpu.dot_dimension_numbers<[1], [0], [0], [1], [0, 0, 1, 1], [], []>} : vector<16x4xf32>, vector<4x8xf32>, vector<16x8xf32> -> vector<16x8xf32>
    %41 = vector.broadcast %39 : vector<1x8xf32> to vector<16x8xf32>
    %42 = arith.addf %40, %41 : vector<16x8xf32>
    %43 = arith.addf %37, %42 : vector<16x8xf32>
    %cst_21 = arith.constant 0.000000e+00 : f32
    %44 = vector.broadcast %cst_21 : f32 to vector<16x8xf32>
    %45 = arith.maximumf %43, %44 : vector<16x8xf32>
    %c64 = arith.constant 64 : index
    %c0_22 = arith.constant 0 : index
    %46 = vector.load %arg1[%c64, %c0_22] : memref<192x32xf32, #tpu.memory_space<vmem>>, vector<8x8xf32>
    %c2_i32_23 = arith.constant 2 : i32
    %47 = tpu.dynamic_rotate %45 by %c2_i32_23 dim 0 : vector<16x8xf32>, i32 -> vector<16x8xf32>
    %cst_24 = arith.constant 0.000000e+00 : f32
    %48 = vector.shape_cast %7 : vector<16x1xi1> to vector<16x1xi1>
    %49 = vector.broadcast %48 : vector<16x1xi1> to vector<16x8xi1>
    %50 = vector.broadcast %cst_24 : f32 to vector<16x8xf32>
    %51 = arith.select %49, %47, %50 : vector<16x8xi1>, vector<16x8xf32>
    %cst_25 = arith.constant dense<0.000000e+00> : vector<16x8xf32>
    %52 = tpu.matmul %51, %46, %cst_25 {dimension_numbers = #tpu.dot_dimension_numbers<[1], [0], [0], [1], [0, 0, 1, 1], [], []>} : vector<16x8xf32>, vector<8x8xf32>, vector<16x8xf32> -> vector<16x8xf32>
    %c72 = arith.constant 72 : index
    %c0_26 = arith.constant 0 : index
    %53 = vector.load %arg1[%c72, %c0_26] : memref<192x32xf32, #tpu.memory_space<vmem>>, vector<8x8xf32>
    %cst_27 = arith.constant dense<0.000000e+00> : vector<16x8xf32>
    %54 = tpu.matmul %45, %53, %cst_27 {dimension_numbers = #tpu.dot_dimension_numbers<[1], [0], [0], [1], [0, 0, 1, 1], [], []>} : vector<16x8xf32>, vector<8x8xf32>, vector<16x8xf32> -> vector<16x8xf32>
    %55 = arith.addf %52, %54 : vector<16x8xf32>
    %c80 = arith.constant 80 : index
    %c0_28 = arith.constant 0 : index
    %56 = vector.load %arg1[%c80, %c0_28] : memref<192x32xf32, #tpu.memory_space<vmem>>, vector<1x8xf32>
    %57 = vector.broadcast %56 : vector<1x8xf32> to vector<16x8xf32>
    %58 = arith.addf %55, %57 : vector<16x8xf32>
    %cst_29 = arith.constant 0.000000e+00 : f32
    %59 = vector.broadcast %cst_29 : f32 to vector<16x8xf32>
    %60 = arith.maximumf %58, %59 : vector<16x8xf32>
    %c88 = arith.constant 88 : index
    %c0_30 = arith.constant 0 : index
    %61 = vector.load %arg1[%c88, %c0_30] : memref<192x32xf32, #tpu.memory_space<vmem>>, vector<8x8xf32>
    %c2_i32_31 = arith.constant 2 : i32
    %62 = tpu.dynamic_rotate %60 by %c2_i32_31 dim 0 : vector<16x8xf32>, i32 -> vector<16x8xf32>
    %cst_32 = arith.constant 0.000000e+00 : f32
    %63 = vector.shape_cast %7 : vector<16x1xi1> to vector<16x1xi1>
    %64 = vector.broadcast %63 : vector<16x1xi1> to vector<16x8xi1>
    %65 = vector.broadcast %cst_32 : f32 to vector<16x8xf32>
    %66 = arith.select %64, %62, %65 : vector<16x8xi1>, vector<16x8xf32>
    %cst_33 = arith.constant dense<0.000000e+00> : vector<16x8xf32>
    %67 = tpu.matmul %66, %61, %cst_33 {dimension_numbers = #tpu.dot_dimension_numbers<[1], [0], [0], [1], [0, 0, 1, 1], [], []>} : vector<16x8xf32>, vector<8x8xf32>, vector<16x8xf32> -> vector<16x8xf32>
    %c96 = arith.constant 96 : index
    %c0_34 = arith.constant 0 : index
    %68 = vector.load %arg1[%c96, %c0_34] : memref<192x32xf32, #tpu.memory_space<vmem>>, vector<8x8xf32>
    %cst_35 = arith.constant dense<0.000000e+00> : vector<16x8xf32>
    %69 = tpu.matmul %60, %68, %cst_35 {dimension_numbers = #tpu.dot_dimension_numbers<[1], [0], [0], [1], [0, 0, 1, 1], [], []>} : vector<16x8xf32>, vector<8x8xf32>, vector<16x8xf32> -> vector<16x8xf32>
    %70 = arith.addf %67, %69 : vector<16x8xf32>
    %c104 = arith.constant 104 : index
    %c0_36 = arith.constant 0 : index
    %71 = vector.load %arg1[%c104, %c0_36] : memref<192x32xf32, #tpu.memory_space<vmem>>, vector<1x8xf32>
    %72 = vector.broadcast %71 : vector<1x8xf32> to vector<16x8xf32>
    %73 = arith.addf %70, %72 : vector<16x8xf32>
    %cst_37 = arith.constant 0.000000e+00 : f32
    %74 = vector.broadcast %cst_37 : f32 to vector<16x8xf32>
    %75 = arith.maximumf %73, %74 : vector<16x8xf32>
    %76 = arith.addf %75, %45 : vector<16x8xf32>
    %cst_38 = arith.constant 0.000000e+00 : f32
    %77 = vector.broadcast %cst_38 : f32 to vector<16x8xf32>
    %78 = arith.maximumf %76, %77 : vector<16x8xf32>
    %79 = vector.shape_cast %78 : vector<16x8xf32> to vector<2x8x8xf32>
    %80 = vector.extract_strided_slice %79 {offsets = [0, 7, 0], sizes = [2, 1, 8], strides = [1, 1, 1]} : vector<2x8x8xf32> to vector<2x1x8xf32>
    %81 = vector.shape_cast %80 : vector<2x1x8xf32> to vector<2x8xf32>
    %c112 = arith.constant 112 : index
    %c0_39 = arith.constant 0 : index
    %82 = vector.load %arg1[%c112, %c0_39] : memref<192x32xf32, #tpu.memory_space<vmem>>, vector<8x32xf32>
    %c120 = arith.constant 120 : index
    %c0_40 = arith.constant 0 : index
    %83 = vector.load %arg1[%c120, %c0_40] : memref<192x32xf32, #tpu.memory_space<vmem>>, vector<1x32xf32>
    %cst_41 = arith.constant dense<0.000000e+00> : vector<2x32xf32>
    %84 = tpu.matmul %81, %82, %cst_41 {dimension_numbers = #tpu.dot_dimension_numbers<[1], [0], [0], [1], [0, 0, 1, 1], [], []>} : vector<2x8xf32>, vector<8x32xf32>, vector<2x32xf32> -> vector<2x32xf32>
    %85 = vector.broadcast %83 : vector<1x32xf32> to vector<2x32xf32>
    %86 = arith.addf %84, %85 : vector<2x32xf32>
    %cst_42 = arith.constant 0.000000e+00 : f32
    %87 = vector.broadcast %cst_42 : f32 to vector<2x32xf32>
    %88 = arith.maximumf %86, %87 : vector<2x32xf32>
    %c128 = arith.constant 128 : index
    %c0_43 = arith.constant 0 : index
    %89 = vector.load %arg1[%c128, %c0_43] : memref<192x32xf32, #tpu.memory_space<vmem>>, vector<32x16xf32>
    %c160 = arith.constant 160 : index
    %c0_44 = arith.constant 0 : index
    %90 = vector.load %arg1[%c160, %c0_44] : memref<192x32xf32, #tpu.memory_space<vmem>>, vector<1x16xf32>
    %cst_45 = arith.constant dense<0.000000e+00> : vector<2x16xf32>
    %91 = tpu.matmul %88, %89, %cst_45 {dimension_numbers = #tpu.dot_dimension_numbers<[1], [0], [0], [1], [0, 0, 1, 1], [], []>} : vector<2x32xf32>, vector<32x16xf32>, vector<2x16xf32> -> vector<2x16xf32>
    %92 = vector.broadcast %90 : vector<1x16xf32> to vector<2x16xf32>
    %93 = arith.addf %91, %92 : vector<2x16xf32>
    %cst_46 = arith.constant 0.000000e+00 : f32
    %94 = vector.broadcast %cst_46 : f32 to vector<2x16xf32>
    %95 = arith.maximumf %93, %94 : vector<2x16xf32>
    %c168 = arith.constant 168 : index
    %c0_47 = arith.constant 0 : index
    %96 = vector.load %arg1[%c168, %c0_47] : memref<192x32xf32, #tpu.memory_space<vmem>>, vector<16x9xf32>
    %c184 = arith.constant 184 : index
    %c0_48 = arith.constant 0 : index
    %97 = vector.load %arg1[%c184, %c0_48] : memref<192x32xf32, #tpu.memory_space<vmem>>, vector<1x9xf32>
    %cst_49 = arith.constant dense<0.000000e+00> : vector<2x9xf32>
    %98 = tpu.matmul %95, %96, %cst_49 {dimension_numbers = #tpu.dot_dimension_numbers<[1], [0], [0], [1], [0, 0, 1, 1], [], []>} : vector<2x16xf32>, vector<16x9xf32>, vector<2x9xf32> -> vector<2x9xf32>
    %99 = vector.broadcast %97 : vector<1x9xf32> to vector<2x9xf32>
    %100 = arith.addf %98, %99 : vector<2x9xf32>
    %c0_50 = arith.constant 0 : index
    %c0_51 = arith.constant 0 : index
    %101 = vector.load %arg2[%c0_50, %c0_51] : memref<2x9xf32, #tpu.memory_space<vmem>>, vector<2x9xf32>
    tpu.vector_store %arg2[%c0_50, %c0_51], %100 {strides = array<i32>} : memref<2x9xf32, #tpu.memory_space<vmem>>, vector<2x9xf32>,
    return
  }
}

</mosaic_0001>

<bundles_post_ra>
// kernel: tpu_custom_call.1
= control target key start
LH: loop header
LB: loop body
LE: loop exit
PB: predicated region body
PF: predicated region fallthrough
CT: control target
= control target key end

     0   :  { %vm36_vm0 = vcmask 1043456   ;;  %vm29_vm1 = vcmask 31744   ;;  %v14_v3 = vlaneseq  ;;  %s1444_s0 = inlined_call_operand.vmem [shape: f32[2,8,4], index: 0, kind: input, shape index: {}]   ;;  %s1445_s1 = inlined_call_operand.vmem [shape: f32[192,32], index: 1, kind: input, shape index: {}]   ;;  %s1446_s2 = inlined_call_operand.hbm [shape: f32[2,9], index: 2, kind: output, shape index: {}]  }
   0x1   :  { %v28_v0 = vld [vmem:[%s1445_s1 + $0x8] sm:$0xf]  ;;  %v12_v1 = vld [vmem:[%s1444_s0] sm:$0xff] }
   0x2   :  { %v13_v2 = vld [vmem:[%s1444_s0 + $0x8] sm:$0xff]  ;;  %1176 = vmatprep.subr.msk.mxu0 %vm36_vm0, %v28_v0  ;;  %v19_v4 = vrot.slane %v12_v1, 7  ;;  %1178 = vmatprep.mubr.msk.f32.mxu0 %vm29_vm1, %v12_v1  ;;  %v18_v6 = vld [vmem:[%s1445_s1] sm:$0xf] }
   0x3   :  { %v20_v5 = vrot.slane %v13_v2, 7 }
   0x4   :  { %7 = vsyncpa [#allocation3], 0  ;;  %1177 = vmatpush3.msk.msra.mxu0 %vm36_vm0, %v28_v0  ;;  %1181 = vmatprep.subr.msk.mxu1 %vm36_vm0, %v18_v6  ;;  %v1303_v7 = vshrl.u32 %v14_v3, 7  ;;  %v215_v12 = vld [vmem:[%s1445_s1 + $0x20] sm:$0xff]  ;;  %v208_v13 = vld [vmem:[%s1445_s1 + $0x18] sm:$0xff]  ;;  %vm216_vm4 = vcmask 64512  }
   0x5   :  { %1179 = vmatmul.mubr.msk.f32.vlgmr.msra.gmra.mxu0 %vm29_vm1, %v13_v2  ;;  %1182 = vmatpush3.msk.msra.mxu1 %vm36_vm0, %v18_v6  ;;  %v388_v14 = vld [vmem:[%s1445_s1 + $0x30] sm:$0xf]  ;;  %v486_v32 = vld [vmem:[%s1445_s1 + $0x48] sm:$0xff]  ;;  %v476_v33 = vld [vmem:[%s1445_s1 + $0x40] sm:$0xff]  ;;  %vm1270_vm7 = vmmov 0   ;;  %vm851_vm8 = vcmask 1041409  }
   0x6   :  { %vm16_vm2 = vcmp.ge.s32.totalorder %v1303_v7, 1  ;;  %vm21_vm3 = vcmp.lt.s32.totalorder %v1303_v7, 1  ;;  %1186 = vmatprep.subr.mxu0 %v215_v12  ;;  %1191 = vmatprep.subr.mxu1 %v208_v13  ;;  %v1113_v17 = vld [vmem:[%s1445_s1 + $0x10] ss:$0 sm:$0xff]  ;;  %v1118_v37 = vld [vmem:[%s1445_s1 + $0x28] ss:$0 sm:$0xff] }
   0x7   :  { %v23_v8 = vsel %vm21_vm3, %v20_v5, %v19_v4  ;;  %v22_v9 = vsel %vm21_vm3, %v19_v4, %v20_v5  ;;  %1187 = vmatpush3.msra.mxu0 %v215_v12  ;;  %v1119_v39 = vld [vmem:[%s1445_s1 + $0x38] ss:$0 sm:$0xff]  ;;  %vm479_vm5 = vcmp.lt.s32.totalorder %v1303_v7, 2  ;;  %vm17_vm6 = vcmp.ge.s32.totalorder %v1303_v7, 2  ;;  %v665_v60 = vld [vmem:[%s1445_s1 + $0x60] sm:$0xff]  ;;  %s1271_s3 = smov [#allocation2]  }
   0x8   :  { %v26_v10 = vsel %vm16_vm2, %v23_v8, 0.0  ;;  %v27_v11 = vsel %vm16_vm2, %v22_v9, 0.0  ;;  %1196 = vmatprep.subr.msk.mxu0 %vm36_vm0, %v388_v14  ;;  %v658_v61 = vld [vmem:[%s1445_s1 + $0x58] sm:$0xff]  ;;  %v1127_v0 = vld [vmem:[%s1445_s1 + $0x50] ss:$0 sm:$0xff]  ;;  %vm935_vm9 = vcmask 261120  }
   0x9   :  { %1183 = vmatprep.mubr.msk.f32.mxu1 %vm29_vm1, %v26_v10  ;;  %v929_v7 = vld [vmem:[%s1445_s1 + $0x98] sm:$0xff]  ;;  %vm1017_vm10 = vcmask 130048   ;;  %s1099_s4 = sshll.u32 %s1271_s3, 4  ;;  %vm1091_vm11 = vcmask 66560   ;;  %s1100_s4 = int_to_ptr.vmem [resolvable:$true] %s1099_s4 }
   0xa   :  { %1184 = vmatmul.mubr.msk.f32.vlgmr.msra.gmra.mxu1 %vm29_vm1, %v27_v11  ;;  %s1247_s5 = scalar_lea.vmem %s1100_s4, 32  ;;  %p1252_p1 = scmp.lt.s32.totalorder %s1100_s4, %s1100_s4 }
   0xb   :  { %1192 = vmatpush3.msra.mxu1 %v208_v13  ;;  %p1248_p0 = scmp.ne.s32.totalorder %s1100_s4, %s1247_s5  ;;  %p1253_p2 = scmp.lt.s32.totalorder %s1247_s5, %s1247_s5 }
   0xc   :  { %1201 = vmatprep.subr.mxu1 %v486_v32 }
   0xd   :  { %p1254_p3 = por %p1253_p2, %p1252_p1 }
   0xf   :  { %p1255_p4 = pnand %p1254_p3, %p1248_p0 }
  0xc5   :  { %v1180_v15 = vpop.f32.mrf.mxu0 }
  0xc7   :  { %v106_v19 = vpop.f32.mrf.mxu0 }
  0xca   :  { %v1185_v16 = vpop.f32.mrf.mxu1 }
  0xcb   :  { %v196_v18 = vadd.f32 %v1185_v16, %v1180_v15  ;;  %v841_v16 = vld [vmem:[%s1445_s1 + $0x70] sm:$0xff] }
  0xcc   :  { %v190_v20 = vpop.f32.mrf.mxu1 }
  0xcd   :  { %v205_v21 = vadd.f32 %v1113_v17, %v196_v18  ;;  %v191_v22 = vadd.f32 %v190_v20, %v106_v19  ;;  %v1132_v20 = vld [vmem:[%s1445_s1 + $0x68] ss:$0 sm:$0xff] }
  0xcf   :  { %v207_v23 = vmax.f32 %v205_v21, 0.0  ;;  %v204_v24 = vadd.f32 %v1113_v17, %v191_v22  ;;  %v1269_v17 = vmov 0.0  }
  0xd1   :  { %v206_v25 = vmax.f32 %v204_v24, 0.0  ;;  %v210_v26 = vrot.slane %v207_v23, 7 }
  0xd3   :  { %v209_v27 = vrot.slane %v206_v25, 7  ;;  %1188 = vmatprep.mubr.msk.f32.mxu0 %vm216_vm4, %v206_v25 }
  0xd4   :  { %1189 = vmatmul.mubr.msk.f32.vlgmr.msra.gmra.mxu0 %vm216_vm4, %v207_v23 }
  0xd5   :  { %v212_v28 = vsel %vm21_vm3, %v210_v26, %v209_v27  ;;  %v211_v29 = vsel %vm21_vm3, %v209_v27, %v210_v26  ;;  %1197 = vmatpush3.msk.msra.mxu0 %vm36_vm0, %v388_v14  ;;  %1198 = vmatprep.mubr.msk.f32.mxu0 %vm29_vm1, %v12_v1 }
  0xd6   :  { %v213_v30 = vsel %vm16_vm2, %v212_v28, 0.0  ;;  %v214_v31 = vsel %vm16_vm2, %v211_v29, 0.0  ;;  %1206 = vmatprep.subr.mxu0 %v476_v33 }
  0xd7   :  { %1193 = vmatprep.mubr.msk.f32.mxu1 %vm216_vm4, %v213_v30 }
  0xd8   :  { %1194 = vmatmul.mubr.msk.f32.vlgmr.msra.gmra.mxu1 %vm216_vm4, %v214_v31  ;;  %1199 = vmatmul.mubr.msk.f32.vlgmr.msra.gmra.mxu0 %vm29_vm1, %v13_v2 }
  0xd9   :  { %1202 = vmatpush3.msra.mxu1 %v486_v32  ;;  %1207 = vmatpush3.msra.mxu0 %v476_v33 }
  0xda   :  { %1211 = vmatprep.subr.mxu1 %v665_v60  ;;  %1216 = vmatprep.subr.mxu0 %v658_v61 }
 0x194   :  { %v1190_v34 = vpop.f32.mrf.mxu0 }
 0x196   :  { %v289_v35 = vpop.f32.mrf.mxu0 }
 0x198   :  { %v1195_v36 = vpop.f32.mrf.mxu1  ;;  %v1200_v38 = vpop.f32.mrf.mxu0 }
 0x199   :  { %v376_v40 = vadd.f32 %v1195_v36, %v1190_v34  ;;  %v469_v44 = vadd.f32 %v1200_v38, %v1119_v39  ;;  %v928_v36 = vld [vmem:[%s1445_s1 + $0x90] sm:$0xff]  ;;  %v926_v38 = vld [vmem:[%s1445_s1 + $0x80] sm:$0xff] }
 0x19a   :  { %v370_v41 = vpop.f32.mrf.mxu1  ;;  %v463_v45 = vpop.f32.mrf.mxu0 }
 0x19b   :  { %v385_v42 = vadd.f32 %v1118_v37, %v376_v40  ;;  %v371_v43 = vadd.f32 %v370_v41, %v289_v35  ;;  %v464_v50 = vadd.f32 %v1119_v39, %v463_v45  ;;  %v1133_v39 = vld [vmem:[%s1445_s1 + $0x78] ss:$0 sm:$0xff]  ;;  %v1010_v45 = vld [vmem:[%s1445_s1 + $0xa8] sm:$0xff] }
 0x19d   :  { %v387_v46 = vmax.f32 %v385_v42, 0.0  ;;  %v384_v47 = vadd.f32 %v1118_v37, %v371_v43  ;;  %v927_v37 = vld [vmem:[%s1445_s1 + $0x88] sm:$0xff] }
 0x19f   :  { %v386_v48 = vmax.f32 %v384_v47, 0.0  ;;  %v473_v49 = vadd.f32 %v469_v44, %v387_v46  ;;  %v1011_v44 = vld [vmem:[%s1445_s1 + $0xb0] sm:$0xff]  ;;  %v1135_v46 = vld [vmem:[%s1445_s1 + $0xa0] ss:$0 sm:$0xff] }
 0x1a1   :  { %v1359_v51 = vmax.f32 %v473_v49, 0.0  ;;  %v472_v52 = vadd.f32 %v464_v50, %v386_v48 }
 0x1a3   :  { %v1361_v53 = vmax.f32 %v472_v52, 0.0  ;;  %v478_v54 = vrot.slane %v1359_v51, 6 }
 0x1a5   :  { %v477_v55 = vrot.slane %v1361_v53, 6  ;;  %1203 = vmatprep.mubr.msk.f32.mxu1 %vm216_vm4, %v1361_v53 }
 0x1a6   :  { %1204 = vmatmul.mubr.msk.f32.vlgmr.msra.gmra.mxu1 %vm216_vm4, %v1359_v51 }
 0x1a7   :  { %v481_v56 = vsel %vm479_vm5, %v478_v54, %v477_v55  ;;  %v480_v57 = vsel %vm479_vm5, %v477_v55, %v478_v54  ;;  %1212 = vmatpush3.msra.mxu1 %v665_v60 }
 0x1a8   :  { %v484_v58 = vsel %vm17_vm6, %v481_v56, 0.0  ;;  %v485_v59 = vsel %vm17_vm6, %v480_v57, 0.0  ;;  %1221 = vmatprep.subr.mxu1 %v1269_v17 }
 0x1a9   :  { %1208 = vmatprep.mubr.msk.f32.mxu0 %vm216_vm4, %v484_v58 }
 0x1aa   :  { %1209 = vmatmul.mubr.msk.f32.vlgmr.msra.gmra.mxu0 %vm216_vm4, %v485_v59 }
 0x1ab   :  { %1217 = vmatpush3.msra.mxu0 %v658_v61 }
 0x1ac   :  { %1226 = vmatprep.subr.mxu0 %v1269_v17 }
 0x266   :  { %v1205_v62 = vpop.f32.mrf.mxu1 }
 0x268   :  { %v559_v2 = vpop.f32.mrf.mxu1 }
 0x26a   :  { %v1210_v63 = vpop.f32.mrf.mxu0 }
 0x26b   :  { %v646_v1 = vadd.f32 %v1210_v63, %v1205_v62 }
 0x26c   :  { %v640_v3 = vpop.f32.mrf.mxu0 }
 0x26d   :  { %v655_v4 = vadd.f32 %v1127_v0, %v646_v1  ;;  %v641_v5 = vadd.f32 %v640_v3, %v559_v2 }
 0x26f   :  { %v657_v6 = vmax.f32 %v655_v4, 0.0  ;;  %v654_v8 = vadd.f32 %v1127_v0, %v641_v5 }
 0x271   :  { %v656_v9 = vmax.f32 %v654_v8, 0.0  ;;  %v660_v10 = vrot.slane %v657_v6, 6 }
 0x273   :  { %v659_v11 = vrot.slane %v656_v9, 6  ;;  %1213 = vmatprep.mubr.msk.f32.mxu1 %vm216_vm4, %v656_v9 }
 0x274   :  { %1214 = vmatmul.mubr.msk.f32.vlgmr.msra.gmra.mxu1 %vm216_vm4, %v657_v6 }
 0x275   :  { %v662_v12 = vsel %vm479_vm5, %v660_v10, %v659_v11  ;;  %v661_v13 = vsel %vm479_vm5, %v659_v11, %v660_v10  ;;  %1223 = vmatprep.mubr.msk.f32.mxu1 %vm1270_vm7, %v1269_v17  ;;  %1222 = vmatpush3.msra.mxu1 %v841_v16 }
 0x276   :  { %v663_v14 = vsel %vm17_vm6, %v662_v12, 0.0  ;;  %v664_v15 = vsel %vm17_vm6, %v661_v13, 0.0  ;;  %1237 = vmatprep.subr.mxu1 %v1269_v17 }
 0x277   :  { %1218 = vmatprep.mubr.msk.f32.mxu0 %vm216_vm4, %v663_v14 }
 0x278   :  { %1219 = vmatmul.mubr.msk.f32.vlgmr.msra.gmra.mxu0 %vm216_vm4, %v664_v15 }
 0x279   :  { %1234 = vmatprep.mubr.msk.f32.mxu0 %vm1270_vm7, %v1269_v17  ;;  %1227 = vmatpush3.msra.mxu0 %v929_v7 }
 0x27a   :  { %1228 = vmatprep.subr.mxu0 %v1269_v17 }
 0x27b   :  { %1229 = vmatpush3.msra.mxu0 %v928_v36 }
 0x27c   :  { %1230 = vmatprep.subr.mxu0 %v1269_v17 }
 0x27d   :  { %1231 = vmatpush3.msra.mxu0 %v927_v37 }
 0x27e   :  { %1232 = vmatprep.subr.mxu0 %v1269_v17 }
 0x27f   :  { %1233 = vmatpush3.msra.mxu0 %v926_v38 }
 0x334   :  { %v1215_v18 = vpop.f32.mrf.mxu1 }
 0x336   :  { %v738_v22 = vpop.f32.mrf.mxu1 }
 0x338   :  { %v1220_v19 = vpop.f32.mrf.mxu0 }
 0x339   :  { %v825_v21 = vadd.f32 %v1220_v19, %v1215_v18 }
 0x33a   :  { %v819_v23 = vpop.f32.mrf.mxu0 }
 0x33b   :  { %v834_v24 = vadd.f32 %v1132_v20, %v825_v21  ;;  %v820_v25 = vadd.f32 %v819_v23, %v738_v22 }
 0x33d   :  { %v836_v26 = vmax.f32 %v834_v24, 0.0  ;;  %v833_v27 = vadd.f32 %v1132_v20, %v820_v25 }
 0x33f   :  { %v838_v28 = vadd.f32 %v836_v26, %v1359_v51  ;;  %v835_v29 = vmax.f32 %v833_v27, 0.0  ;;  %v1137_v51 = vld [vmem:[%s1445_s1 + $0xb8] ss:$0 sm:$0xff] }
 0x341   :  { %v840_v30 = vmax.f32 %v838_v28, 0.0  ;;  %v837_v31 = vadd.f32 %v835_v29, %v1361_v53 }
 0x343   :  { %v839_v32 = vmax.f32 %v837_v31, 0.0  ;;  %v850_v33 = vrot.slane %v840_v30, 6 }
 0x345   :  { %v849_v34 = vrot.slane %v839_v32, 7 }
 0x347   :  { %v852_v35 = vsel %vm851_vm8, %v850_v33, %v849_v34 }
 0x348   :  { %1224 = vmatmul.mubr.msk.f32.vlgmr.msra.gmra.mxu1 %vm216_vm4, %v852_v35 }
 0x349   :  { %1241 = vmatprep.mubr.msk.f32.mxu1 %vm1270_vm7, %v1269_v17  ;;  %1238 = vmatpush3.msra.mxu1 %v1011_v44 }
 0x34a   :  { %1239 = vmatprep.subr.mxu1 %v1269_v17 }
 0x34b   :  { %1240 = vmatpush3.msra.mxu1 %v1010_v45 }
 0x408   :  { %v921_v40 = vpop.f32.mrf.mxu1 }
 0x409   :  { %v922_v41 = vadd.f32 %v1133_v39, %v921_v40 }
 0x40a   :  { %v1225_v42 = vpop.f32.mrf.mxu1 }
 0x40b   :  { %v925_v43 = vmax.f32 %v922_v41, 0.0 }
 0x40d   :  { %1235 = vmatmul.mubr.msk.f32.vlgmr.msra.gmra.mxu0 %vm935_vm9, %v925_v43 }
 0x4cd   :  { %v1005_v47 = vpop.f32.mrf.mxu0 }
 0x4ce   :  { %v1006_v48 = vadd.f32 %v1135_v46, %v1005_v47 }
 0x4cf   :  { %v1236_v49 = vpop.f32.mrf.mxu0 }
 0x4d0   :  { %v1009_v50 = vmax.f32 %v1006_v48, 0.0 }
 0x4d2   :  { %1242 = vmatmul.mubr.msk.f32.vlgmr.msra.gmra.mxu1 %vm1017_vm10, %v1009_v50 }
 0x592   :  { %v1087_v52 = vpop.f32.mrf.mxu1 }
 0x593   :  { %v1088_v53 = vadd.f32 %v1137_v51, %v1087_v52 }
 0x594   :  { %v1243_v54 = vpop.f32.mrf.mxu1 }
 0x595   :  { %1092 = vst.msk [vmem:[#allocation2] sm:$0x3] %vm1091_vm11, %v1088_v53 }
 0x596   :  { %1258 = shalt.err (!%p1255_p4)
}
 0x597   :  { %1102 = dma.vmem_to_hbm [thread:$0]  %s1100_s4, 32, %s1446_s2, [#allocation3]  }
 0x598   :  { %1267 = dma.done.wait [#allocation3], 32  }
 0x599   :  { %1268 = vsyncadd [#allocation3], 4294967264 }
 0x59a   :  { %1106 = vsyncpa [#allocation3], 1 }

</bundles_post_ra>
